<compile_context>
chip_gen: v6e
topology: v6e:2x2x1
jax: 0.10.0
libtpu: 0.0.40
codegen_flags: <defaults>
</compile_context>

<pallas_src>
import jax
import jax.numpy as jnp
from jax.experimental import pallas as pl
from jax.experimental.pallas import tpu as pltpu

_MIB = 1024 * 1024


def _round_up(a, m):
    return (a + m - 1) // m * m


def _mish_kernel(x_ref, o_ref):
    x = x_ref[...]
    xf = x.astype(jnp.float32)
    # mish(x) = x * tanh(softplus(x)) = x * m / (m + 2),  m = t*(t+2), t = e^x
    # (since tanh(log(1+t)) = ((1+t)^2 - 1) / ((1+t)^2 + 1)).
    # Clamp the exponent so t^2 cannot overflow f32; for x >= 20 the ratio
    # rounds to 1.0 so the result is ~x, matching the reference.
    t = jnp.exp(jnp.minimum(xf, 20.0))
    m = t * (t + 2.0)
    o_ref[...] = (xf * (m / (m + 2.0))).astype(o_ref.dtype)


def _block_budget():
    """(block_bytes, vmem_limit_bytes), tuned per TPU generation.

    v5e/v6e (128 MiB VMEM): 4 MiB blocks already sit on the measured 85%+
    HBM-roofline plateau.  v7x (64 MiB VMEM, ~3.2 TB/s HBM): 8 MiB blocks
    amortize the ~0.35 us per-grid-step overhead that v7x's faster HBM makes
    relatively expensive.  Detection is best-effort; the fallback is safe on
    every generation.
    """
    block_bytes = 4 * _MIB
    try:
        cap = getattr(pltpu.get_tpu_info(), "vmem_capacity_bytes", None)
        if cap is not None and cap <= 64 * _MIB:  # v7x-class TensorCore
            block_bytes = 8 * _MIB
    except Exception:
        pass
    # in + out, double-buffered, plus compiler-scratch headroom.
    vmem_limit = 4 * block_bytes + 16 * _MIB
    return block_bytes, vmem_limit


def mish(x):
    """Elementwise Mish via Pallas. Any shape; floating dtypes (f32 math)."""
    orig_shape = x.shape
    dtype = x.dtype
    n = x.size
    if n == 0:
        return x
    itemsize = jnp.dtype(dtype).itemsize

    block_bytes, vmem_limit = _block_budget()
    # dtype-aware sublane granule: 8 (f32), 16 (bf16), 32 (int8/fp8).
    sub_min = max(8, 32 // itemsize)

    # ---- choose a free (no-copy, no-pad) 2-D view --------------------------
    if n % 1024 == 0:            # lane-dense wide slab -> unmasked multi-vreg vst
        R, C = n // 1024, 1024
    elif n % 128 == 0:
        R, C = n // 128, 128
    elif x.ndim >= 2:            # unaligned size: collapse leading dims only
        R, C = n // orig_shape[-1], orig_shape[-1]
    else:
        R, C = 1, n
    slab = x.reshape(R, C)

    # ---- tile sizes ---------------------------------------------------------
    row_bytes = C * itemsize
    if sub_min * row_bytes <= block_bytes or C <= 128:
        tc = C                    # whole rows per block (the usual case)
    else:                         # only hit for a huge, unaligned last dim
        tc = max(128, (block_bytes // (sub_min * itemsize)) // 128 * 128)

    tr_max = max(sub_min, (block_bytes // (tc * itemsize)) // sub_min * sub_min)
    total_bytes = n * itemsize
    if total_bytes <= 256 * 1024 or R <= sub_min:
        tr = R                    # tiny input: one full-array block is fine
    else:
        # >= 4 blocks so the DMA pipeline double-buffers, and an even count so
        # v7x's two TensorCores split this embarrassingly parallel grid evenly
        # (best effort; sub_min rounding can occasionally shift it by one).
        nb = max(4, pl.cdiv(R, tr_max))
        nb += nb % 2
        tr = min(R, _round_up(pl.cdiv(R, nb), sub_min))

    grid = (pl.cdiv(R, tr), pl.cdiv(C, tc))  # ragged edges are masked by Pallas

    out = pl.pallas_call(
        _mish_kernel,
        out_shape=jax.ShapeDtypeStruct((R, C), dtype),
        grid=grid,
        in_specs=[pl.BlockSpec((tr, tc), lambda i, j: (i, j))],
        out_specs=pl.BlockSpec((tr, tc), lambda i, j: (i, j)),
        compiler_params=pltpu.CompilerParams(
            dimension_semantics=("parallel", "parallel"),
            vmem_limit_bytes=vmem_limit,
        ),
        cost_estimate=pl.CostEstimate(
            flops=6 * n,                    # min, +, *, +, /, * per element
            transcendentals=n,              # one exp per element
            bytes_accessed=2 * n * itemsize,
        ),
    )(slab)

    return out.reshape(orig_shape)


def mish_ref(x):
    xf = x.astype(jnp.float32)
    return (xf * jnp.tanh(jax.nn.softplus(xf))).astype(x.dtype)


if __name__ == "__main__":
    key = jax.random.PRNGKey(0)

    # Module has no parameters; example input matches a typical NCHW activation.
    x = jax.random.normal(key, (2, 4, 16, 16), dtype=jnp.float32) * 3.0
    y = mish(x)
    jax.block_until_ready(y)
    assert y.shape == x.shape and y.dtype == x.dtype
    assert jnp.allclose(y, mish_ref(x), atol=1e-5, rtol=1e-5)

    # Multi-block grid with a ragged (masked) final row block.
    x2 = jax.random.normal(jax.random.PRNGKey(1), (3, 7, 64, 64),
                           dtype=jnp.float32) * 3.0
    y2 = mish(x2)
    jax.block_until_ready(y2)
    assert jnp.allclose(y2, mish_ref(x2), atol=1e-5, rtol=1e-5)

    # Non-128-aligned size: no pad/slice, free collapse to (105, 11).
    x3 = jax.random.normal(jax.random.PRNGKey(2), (3, 5, 7, 11),
                           dtype=jnp.float32) * 3.0
    y3 = mish(x3)
    jax.block_until_ready(y3)
    assert jnp.allclose(y3, mish_ref(x3), atol=1e-5, rtol=1e-5)

    print("KERNEL_OK")
</pallas_src>

<mosaic_0001>
module attributes {stable_mosaic.version = 11 : i64} {
  func.func @_mish_kernel(%arg0: i32, %arg1: i32, %arg2: memref<2x1024xf32, #tpu.memory_space<vmem>>, %arg3: memref<2x1024xf32, #tpu.memory_space<vmem>>) attributes {dimension_semantics = [#tpu.dimension_semantics<parallel>, #tpu.dimension_semantics<parallel>], iteration_bounds = array<i64: 1, 1>, scalar_prefetch = 0 : i64, scratch_operands = 0 : i64, tpu.core_type = #tpu.core_type<tc>, window_params = [{transform_indices = @transform_0, window_bounds = array<i64: 2, 1024>}, {transform_indices = @transform_1, window_bounds = array<i64: 2, 1024>}]} {
    %c0 = arith.constant 0 : index
    %c0_0 = arith.constant 0 : index
    %0 = vector.load %arg2[%c0, %c0_0] : memref<2x1024xf32, #tpu.memory_space<vmem>>, vector<2x1024xf32>
    %cst = arith.constant 2.000000e+01 : f32
    %1 = vector.broadcast %cst : f32 to vector<2x1024xf32>
    %2 = arith.minimumf %0, %1 : vector<2x1024xf32>
    %3 = math.exp %2 : vector<2x1024xf32>
    %cst_1 = arith.constant 2.000000e+00 : f32
    %4 = vector.broadcast %cst_1 : f32 to vector<2x1024xf32>
    %5 = arith.addf %3, %4 : vector<2x1024xf32>
    %6 = arith.mulf %3, %5 : vector<2x1024xf32>
    %cst_2 = arith.constant 2.000000e+00 : f32
    %7 = vector.broadcast %cst_2 : f32 to vector<2x1024xf32>
    %8 = arith.addf %6, %7 : vector<2x1024xf32>
    %9 = arith.divf %6, %8 : vector<2x1024xf32>
    %10 = arith.mulf %0, %9 : vector<2x1024xf32>
    %c0_3 = arith.constant 0 : index
    %c0_4 = arith.constant 0 : index
    %11 = vector.load %arg3[%c0_3, %c0_4] : memref<2x1024xf32, #tpu.memory_space<vmem>>, vector<2x1024xf32>
    tpu.vector_store %arg3[%c0_3, %c0_4], %10 {strides = array<i32>} : memref<2x1024xf32, #tpu.memory_space<vmem>>, vector<2x1024xf32>,
    return
  }
  func.func @transform_0(%arg0: i32, %arg1: i32) -> (i32, i32) {
    %c0_i32 = arith.constant 0 : i32
    return %arg0, %arg1 : i32, i32
  }
  func.func @transform_1(%arg0: i32, %arg1: i32) -> (i32, i32) {
    %c0_i32 = arith.constant 0 : i32
    return %arg0, %arg1 : i32, i32
  }
}

</mosaic_0001>

<bundles_post_ra>
// kernel: tpu_custom_call.1
= control target key start
LH: loop header
LB: loop body
LE: loop exit
PB: predicated region body
PF: predicated region fallthrough
CT: control target
= control target key end

     0   :  { %6 = vsyncpa [#allocation3], 0  ;;  %s130_s0 = inlined_call_operand.hbm [shape: f32[2,1024], index: 0, kind: input, shape index: {}]   ;;  %s131_s1 = inlined_call_operand.hbm [shape: f32[2,1024], index: 1, kind: output, shape index: {}]  }
   0x1   :  { %7 = vsyncpa [#allocation4], 0  ;;  %s112_s6 = smov [#allocation2]  }
   0x2   :  { %s14_s7 = sshll.u32 %s112_s6, 4  ;;  %s15_s7 = int_to_ptr.vmem [resolvable:$true] %s14_s7 }
   0x3   :  { %s76_s8 = scalar_lea.vmem %s15_s7, 256  ;;  %p81_p1 = scmp.lt.s32.totalorder %s15_s7, %s15_s7 }
   0x4   :  { %p77_p0 = scmp.ne.s32.totalorder %s15_s7, %s76_s8  ;;  %p82_p2 = scmp.lt.s32.totalorder %s76_s8, %s76_s8 }
   0x6   :  { %p83_p3 = por %p82_p2, %p81_p1 }
   0x8   :  { %p84_p4 = pnand %p83_p3, %p77_p0 }
   0xa   :  { %87 = shalt.err (!%p84_p4)
}
   0xb   :  { %17 = dma.hbm_to_vmem [thread:$0]  %s130_s0, 256, %s15_s7, [#allocation3]  }
   0xc   :  { %108 = dma.done.wait [#allocation3], 256  }
   0xd   :  { %109 = vsyncadd [#allocation3], 4294967040  ;;  %v21_v0 = vld [vmem:[#allocation2] sm:$0xff]  ;;  %v22_v1 = vld [vmem:[#allocation2 + $0x8] sm:$0xff]  ;;  %s113_s0 = smov [#allocation5]  }
   0xe   :  { %v23_v2 = vmin.f32 %v21_v0, 20.0  ;;  %v24_v3 = vmin.f32 %v22_v1, 20.0  ;;  %s49_s11 = sshll.u32 %s113_s0, 4  ;;  %s50_s11 = int_to_ptr.vmem [resolvable:$true] %s49_s11 }
   0xf   :  { %s88_s12 = scalar_lea.vmem %s50_s11, 256  ;;  %p93_p6 = scmp.lt.s32.totalorder %s50_s11, %s50_s11 }
  0x10   :  { %v25_v4 = vmul.f32 1.442695, %v23_v2  ;;  %v27_v5 = vmul.f32 1.442695, %v24_v3  ;;  %p89_p5 = scmp.ne.s32.totalorder %s50_s11, %s88_s12  ;;  %p94_p7 = scmp.lt.s32.totalorder %s88_s12, %s88_s12 }
  0x12   :  { %60 = vpow2.f32 %v25_v4  ;;  %p95_p8 = por %p94_p7, %p93_p6 }
  0x13   :  { %62 = vpow2.f32 %v27_v5 }
  0x14   :  { %p96_p9 = pnand %p95_p8, %p89_p5 }
  0x1f   :  { %v61_v6 = vpop.eup %60 }
  0x20   :  { %v63_v7 = vpop.eup %62  ;;  %v29_v8 = vadd.f32 2.0, %v61_v6 }
  0x21   :  { %v30_v9 = vadd.f32 2.0, %v63_v7 }
  0x22   :  { %v31_v10 = vmul.f32 %v61_v6, %v29_v8 }
  0x23   :  { %v32_v11 = vmul.f32 %v63_v7, %v30_v9 }
  0x24   :  { %v33_v12 = vadd.f32 2.0, %v31_v10 }
  0x25   :  { %v34_v13 = vadd.f32 2.0, %v32_v11 }
  0x26   :  { %64 = vrcp.f32 %v33_v12 }
  0x27   :  { %66 = vrcp.f32 %v34_v13 }
  0x33   :  { %v65_v14 = vpop.eup %64 }
  0x34   :  { %v67_v15 = vpop.eup %66  ;;  %v36_v16 = vmul.f32 %v65_v14, %v31_v10 }
  0x35   :  { %v38_v17 = vmul.f32 %v67_v15, %v32_v11 }
  0x36   :  { %v39_v18 = vmul.f32 %v36_v16, %v21_v0 }
  0x37   :  { %v40_v19 = vmul.f32 %v38_v17, %v22_v1 }
  0x38   :  { %41 = vst [vmem:[#allocation5] sm:$0xff] %v39_v18 }
  0x39   :  { %42 = vst [vmem:[#allocation5 + $0x8] sm:$0xff] %v40_v19 }
  0x3a   :  { %99 = shalt.err (!%p96_p9)
}
  0x3b   :  { %52 = dma.vmem_to_hbm [thread:$0]  %s50_s11, 256, %s131_s1, [#allocation4]  }
  0x3c   :  { %110 = dma.done.wait [#allocation4], 256  }
  0x3d   :  { %111 = vsyncadd [#allocation4], 4294967040 }
  0x3e   :  { %56 = vsyncpa [#allocation3], 1 }
  0x3f   :  { %57 = vsyncpa [#allocation4], 1 }

</bundles_post_ra>
